<compile_context>
chip_gen: v7x
topology: tpu7x:2x2x1
jax: 0.10.0
libtpu: 0.0.40
codegen_flags: <defaults>
</compile_context>

<pallas_src>
import functools

import jax
import jax.numpy as jnp
from jax import lax
from jax.experimental import pallas as pl
from jax.experimental.pallas import tpu as pltpu

LOG_STD_MAX = 2.0
LOG_STD_MIN = -5.0
# sigma = C0 + C1 * tanh(logits)   (affine folded at trace time)
SIGMA_C1 = 0.5 * (LOG_STD_MAX - LOG_STD_MIN)          # 3.5
SIGMA_C0 = LOG_STD_MIN + SIGMA_C1                     # -1.5


def _round_up(n, m):
    return ((n + m - 1) // m) * m


def _pad2(x, rows, cols):
    r, c = x.shape
    if r == rows and c == cols:
        return x
    return jnp.pad(x, ((0, rows - r), (0, cols - c)))


def actor_forward_kernel(x_ref, w1_ref, b1_ref, w2_ref, b2_ref,
                         wh_ref, bh_ref, out_ref, *, n_actions):
    x = x_ref[...]                       # (TB, Dp)   -- narrow, un-inflated state

    # fc1 + relu (K = Dp is small; legal and cheap on the MXU)
    h1 = jnp.dot(x, w1_ref[...], preferred_element_type=jnp.float32) + b1_ref[...]
    h1 = jnp.maximum(h1, 0.0)

    # fc2 + relu
    h2 = jnp.dot(h1, w2_ref[...], preferred_element_type=jnp.float32) + b2_ref[...]
    h2 = jnp.maximum(h2, 0.0)

    # Fused heads: columns [0, n_actions) are mu, [n_actions, 2*n_actions) are
    # the sigma-head logits.  Single matmul -> half the head MXU pushes.
    heads = jnp.dot(h2, wh_ref[...], preferred_element_type=jnp.float32) + bh_ref[...]

    # sigma = C0 + C1 * tanh(logits)  (EUP tanh + one VPU FMA)
    sig = SIGMA_C0 + SIGMA_C1 * jnp.tanh(heads)

    # Tiny (1, H) lane mask blended in; mu lanes keep the raw head output.
    lane = lax.broadcasted_iota(jnp.int32, (1, heads.shape[-1]), 1)
    out_ref[...] = jnp.where(lane >= n_actions, sig, heads)


def pack_params(params):
    """Concatenate the two heads and pad VMEM-resident dims once, offline.

    Only the hidden (VMEM-only) dims are padded to 128 lanes; the state width
    and the head output width stay narrow so HBM traffic is not inflated.
    """
    w1, b1 = params["w1"], params["b1"]
    w2, b2 = params["w2"], params["b2"]
    wh = jnp.concatenate([params["wmu"], params["wsg"]], axis=1)   # (F2, 2A)
    bh = jnp.concatenate([params["bmu"], params["bsg"]], axis=1)   # (1, 2A)

    D, F1 = w1.shape
    F2 = w2.shape[1]
    H = wh.shape[1]                       # 2 * n_actions (kept narrow)
    Dp = _round_up(D, 8)                  # sublane-align fc1 contraction dim only
    F1p = _round_up(F1, 128)
    F2p = _round_up(F2, 128)

    return {
        "w1": _pad2(w1, Dp, F1p), "b1": _pad2(b1, 1, F1p),
        "w2": _pad2(w2, F1p, F2p), "b2": _pad2(b2, 1, F2p),
        "wh": _pad2(wh, F2p, H), "bh": _pad2(bh, 1, H),
    }


def actor_forward(state, packed, n_actions, *, batch_tile=1024):
    """state: (B, input_dim) float32. packed: output of pack_params()."""
    B, D = state.shape
    Dp, F1p = packed["w1"].shape
    F2p = packed["w2"].shape[1]
    H = packed["wh"].shape[1]             # 2 * n_actions

    # --- batch tiling -------------------------------------------------------
    # * TB always a multiple of 8 (BlockSpec sublane constraint).
    # * Tiles balanced so the tail tile never wastes ~TB padded rows.
    # * >=2 tiles whenever the batch spans >=2 sublane groups, so the
    #   ("parallel",) grid axis can shard across both TensorCores on v7x.
    batch_tile = max(8, _round_up(batch_tile, 8))
    bp_min = _round_up(B, 8)
    n_tiles = pl.cdiv(bp_min, batch_tile)
    if bp_min >= 16:
        n_tiles = max(n_tiles, 2)
    TB = _round_up(pl.cdiv(bp_min, n_tiles), 8)
    Bp = TB * n_tiles

    if Bp == B and Dp == D:
        xp = state
    else:
        xp = jnp.pad(state, ((0, Bp - B), (0, Dp - D)))   # rows (+ <=7 cols) only

    kernel = functools.partial(actor_forward_kernel, n_actions=n_actions)

    out = pl.pallas_call(
        kernel,
        out_shape=jax.ShapeDtypeStruct((Bp, H), jnp.float32),
        grid_spec=pltpu.PrefetchScalarGridSpec(
            num_scalar_prefetch=0,
            grid=(n_tiles,),
            in_specs=[
                pl.BlockSpec((TB, Dp), lambda i: (i, 0)),    # state tile (narrow)
                pl.BlockSpec((Dp, F1p), lambda i: (0, 0)),   # weights VMEM-resident
                pl.BlockSpec((1, F1p), lambda i: (0, 0)),
                pl.BlockSpec((F1p, F2p), lambda i: (0, 0)),
                pl.BlockSpec((1, F2p), lambda i: (0, 0)),
                pl.BlockSpec((F2p, H), lambda i: (0, 0)),
                pl.BlockSpec((1, H), lambda i: (0, 0)),
            ],
            out_specs=pl.BlockSpec((TB, H), lambda i: (i, 0)),  # narrow output slab
        ),
        compiler_params=pltpu.CompilerParams(
            dimension_semantics=("parallel",)),   # shards batch grid across TCs on v7x
    )(xp, packed["w1"], packed["b1"], packed["w2"], packed["b2"],
      packed["wh"], packed["bh"])

    mu = out[:B, :n_actions]
    sigma = out[:B, n_actions:]
    return mu, sigma


def init_params(key, input_dim, fc1_dims, fc2_dims, n_actions):
    """Deterministic PyTorch-Linear-style init: U(-1/sqrt(fan_in), 1/sqrt(fan_in))."""
    def linear(key, fan_in, fan_out):
        kw, kb = jax.random.split(key)
        bound = 1.0 / jnp.sqrt(jnp.float32(fan_in))
        w = jax.random.uniform(kw, (fan_in, fan_out), jnp.float32, -bound, bound)
        b = jax.random.uniform(kb, (1, fan_out), jnp.float32, -bound, bound)
        return w, b

    k1, k2, k3, k4 = jax.random.split(key, 4)
    w1, b1 = linear(k1, input_dim, fc1_dims)
    w2, b2 = linear(k2, fc1_dims, fc2_dims)
    wmu, bmu = linear(k3, fc2_dims, n_actions)
    wsg, bsg = linear(k4, fc2_dims, n_actions)
    return {"w1": w1, "b1": b1, "w2": w2, "b2": b2,
            "wmu": wmu, "bmu": bmu, "wsg": wsg, "bsg": bsg}


def actor_forward_ref(state, params):
    """Pure-JAX reference (unpadded, unfused); HIGHEST precision so the f32
    Mosaic matmuls and the XLA reference agree tightly."""
    hp = lax.Precision.HIGHEST
    h1 = jnp.maximum(jnp.dot(state, params["w1"], precision=hp) + params["b1"], 0.0)
    h2 = jnp.maximum(jnp.dot(h1, params["w2"], precision=hp) + params["b2"], 0.0)
    mu = jnp.dot(h2, params["wmu"], precision=hp) + params["bmu"]
    log_std = jnp.tanh(jnp.dot(h2, params["wsg"], precision=hp) + params["bsg"])
    sigma = LOG_STD_MIN + 0.5 * (LOG_STD_MAX - LOG_STD_MIN) * (log_std + 1.0)
    return mu, sigma


if __name__ == "__main__":
    # Small shapes consistent with the module: input_dims=(8,), fc1=32, fc2=32,
    # n_actions=4, batch=2.
    batch, input_dim, fc1_dims, fc2_dims, n_actions = 2, 8, 32, 32, 4

    key = jax.random.PRNGKey(0)
    k_params, k_state = jax.random.split(key)
    params = init_params(k_params, input_dim, fc1_dims, fc2_dims, n_actions)
    state = jax.random.normal(k_state, (batch, input_dim), dtype=jnp.float32)

    packed = pack_params(params)          # head fusion + one-off padding
    mu, sigma = actor_forward(state, packed, n_actions)
    jax.block_until_ready((mu, sigma))

    mu_ref, sigma_ref = actor_forward_ref(state, params)
    assert mu.shape == (batch, n_actions) and sigma.shape == (batch, n_actions)
    assert jnp.allclose(mu, mu_ref, atol=1e-4, rtol=1e-4)
    assert jnp.allclose(sigma, sigma_ref, atol=1e-4, rtol=1e-4)

    # TODO(synk): get_action's Normal.rsample / log_prob sampling path is
    # stochastic policy-sampling logic outside forward(); not implemented here.
    print("KERNEL_OK")
</pallas_src>

<mosaic_0001>
module attributes {stable_mosaic.version = 11 : i64} {
  func.func @actor_forward_kernel(%arg0: i32, %arg1: memref<8x8xf32, #tpu.memory_space<vmem>>, %arg2: memref<8x128xf32, #tpu.memory_space<vmem>>, %arg3: memref<1x128xf32, #tpu.memory_space<vmem>>, %arg4: memref<128x128xf32, #tpu.memory_space<vmem>>, %arg5: memref<1x128xf32, #tpu.memory_space<vmem>>, %arg6: memref<128x8xf32, #tpu.memory_space<vmem>>, %arg7: memref<1x8xf32, #tpu.memory_space<vmem>>, %arg8: memref<8x8xf32, #tpu.memory_space<vmem>>) attributes {dimension_semantics = [#tpu.dimension_semantics<parallel>], iteration_bounds = array<i64: 1>, scalar_prefetch = 0 : i64, scratch_operands = 0 : i64, tpu.core_type = #tpu.core_type<tc>, window_params = [{transform_indices = @transform_0, window_bounds = array<i64: 8, 8>}, {pipeline_mode = #tpu.pipeline_mode<synchronous>, transform_indices = @transform_1, window_bounds = array<i64: 8, 128>}, {pipeline_mode = #tpu.pipeline_mode<synchronous>, transform_indices = @transform_2, window_bounds = array<i64: 1, 128>}, {pipeline_mode = #tpu.pipeline_mode<synchronous>, transform_indices = @transform_3, window_bounds = array<i64: 128, 128>}, {pipeline_mode = #tpu.pipeline_mode<synchronous>, transform_indices = @transform_4, window_bounds = array<i64: 1, 128>}, {pipeline_mode = #tpu.pipeline_mode<synchronous>, transform_indices = @transform_5, window_bounds = array<i64: 128, 8>}, {pipeline_mode = #tpu.pipeline_mode<synchronous>, transform_indices = @transform_6, window_bounds = array<i64: 1, 8>}, {transform_indices = @transform_7, window_bounds = array<i64: 8, 8>}]} {
    %c0 = arith.constant 0 : index
    %c0_0 = arith.constant 0 : index
    %0 = vector.load %arg1[%c0, %c0_0] : memref<8x8xf32, #tpu.memory_space<vmem>>, vector<8x8xf32>
    %c0_1 = arith.constant 0 : index
    %c0_2 = arith.constant 0 : index
    %1 = vector.load %arg2[%c0_1, %c0_2] : memref<8x128xf32, #tpu.memory_space<vmem>>, vector<8x128xf32>
    %cst = arith.constant dense<0.000000e+00> : vector<8x128xf32>
    %2 = tpu.matmul %0, %1, %cst {dimension_numbers = #tpu.dot_dimension_numbers<[1], [0], [0], [1], [0, 0, 1, 1], [], []>} : vector<8x8xf32>, vector<8x128xf32>, vector<8x128xf32> -> vector<8x128xf32>
    %c0_3 = arith.constant 0 : index
    %c0_4 = arith.constant 0 : index
    %3 = vector.load %arg3[%c0_3, %c0_4] : memref<1x128xf32, #tpu.memory_space<vmem>>, vector<1x128xf32>
    %4 = vector.broadcast %3 : vector<1x128xf32> to vector<8x128xf32>
    %5 = arith.addf %2, %4 : vector<8x128xf32>
    %cst_5 = arith.constant 0.000000e+00 : f32
    %6 = vector.broadcast %cst_5 : f32 to vector<8x128xf32>
    %7 = arith.maximumf %5, %6 : vector<8x128xf32>
    %c0_6 = arith.constant 0 : index
    %c0_7 = arith.constant 0 : index
    %8 = vector.load %arg4[%c0_6, %c0_7] : memref<128x128xf32, #tpu.memory_space<vmem>>, vector<128x128xf32>
    %cst_8 = arith.constant dense<0.000000e+00> : vector<8x128xf32>
    %9 = tpu.matmul %7, %8, %cst_8 {dimension_numbers = #tpu.dot_dimension_numbers<[1], [0], [0], [1], [0, 0, 1, 1], [], []>} : vector<8x128xf32>, vector<128x128xf32>, vector<8x128xf32> -> vector<8x128xf32>
    %c0_9 = arith.constant 0 : index
    %c0_10 = arith.constant 0 : index
    %10 = vector.load %arg5[%c0_9, %c0_10] : memref<1x128xf32, #tpu.memory_space<vmem>>, vector<1x128xf32>
    %11 = vector.broadcast %10 : vector<1x128xf32> to vector<8x128xf32>
    %12 = arith.addf %9, %11 : vector<8x128xf32>
    %cst_11 = arith.constant 0.000000e+00 : f32
    %13 = vector.broadcast %cst_11 : f32 to vector<8x128xf32>
    %14 = arith.maximumf %12, %13 : vector<8x128xf32>
    %c0_12 = arith.constant 0 : index
    %c0_13 = arith.constant 0 : index
    %15 = vector.load %arg6[%c0_12, %c0_13] : memref<128x8xf32, #tpu.memory_space<vmem>>, vector<128x8xf32>
    %cst_14 = arith.constant dense<0.000000e+00> : vector<8x8xf32>
    %16 = tpu.matmul %14, %15, %cst_14 {dimension_numbers = #tpu.dot_dimension_numbers<[1], [0], [0], [1], [0, 0, 1, 1], [], []>} : vector<8x128xf32>, vector<128x8xf32>, vector<8x8xf32> -> vector<8x8xf32>
    %c0_15 = arith.constant 0 : index
    %c0_16 = arith.constant 0 : index
    %17 = vector.load %arg7[%c0_15, %c0_16] : memref<1x8xf32, #tpu.memory_space<vmem>>, vector<1x8xf32>
    %18 = vector.broadcast %17 : vector<1x8xf32> to vector<8x8xf32>
    %19 = arith.addf %16, %18 : vector<8x8xf32>
    %20 = math.tanh %19 : vector<8x8xf32>
    %cst_17 = arith.constant 3.500000e+00 : f32
    %21 = vector.broadcast %cst_17 : f32 to vector<8x8xf32>
    %22 = arith.mulf %21, %20 : vector<8x8xf32>
    %cst_18 = arith.constant -1.500000e+00 : f32
    %23 = vector.broadcast %cst_18 : f32 to vector<8x8xf32>
    %24 = arith.addf %23, %22 : vector<8x8xf32>
    %25 = tpu.iota {dimensions = array<i32: 1>} : vector<1x8xi32>
    %c4_i32 = arith.constant 4 : i32
    %26 = vector.broadcast %c4_i32 : i32 to vector<1x8xi32>
    %27 = arith.cmpi sge, %25, %26 : vector<1x8xi32>
    %28 = vector.shape_cast %27 : vector<1x8xi1> to vector<1x8xi1>
    %29 = vector.broadcast %28 : vector<1x8xi1> to vector<8x8xi1>
    %30 = arith.select %29, %24, %19 : vector<8x8xi1>, vector<8x8xf32>
    %c0_19 = arith.constant 0 : index
    %c0_20 = arith.constant 0 : index
    %31 = vector.load %arg8[%c0_19, %c0_20] : memref<8x8xf32, #tpu.memory_space<vmem>>, vector<8x8xf32>
    tpu.vector_store %arg8[%c0_19, %c0_20], %30 {strides = array<i32>} : memref<8x8xf32, #tpu.memory_space<vmem>>, vector<8x8xf32>,
    return
  }
  func.func @transform_0(%arg0: i32) -> (i32, i32) {
    %c0_i32 = arith.constant 0 : i32
    %c0_i32_0 = arith.constant 0 : i32
    return %arg0, %c0_i32 : i32, i32
  }
  func.func @transform_1(%arg0: i32) -> (i32, i32) {
    %c0_i32 = arith.constant 0 : i32
    %c0_i32_0 = arith.constant 0 : i32
    %c0_i32_1 = arith.constant 0 : i32
    return %c0_i32, %c0_i32_0 : i32, i32
  }
  func.func @transform_2(%arg0: i32) -> (i32, i32) {
    %c0_i32 = arith.constant 0 : i32
    %c0_i32_0 = arith.constant 0 : i32
    %c0_i32_1 = arith.constant 0 : i32
    return %c0_i32, %c0_i32_0 : i32, i32
  }
  func.func @transform_3(%arg0: i32) -> (i32, i32) {
    %c0_i32 = arith.constant 0 : i32
    %c0_i32_0 = arith.constant 0 : i32
    %c0_i32_1 = arith.constant 0 : i32
    return %c0_i32, %c0_i32_0 : i32, i32
  }
  func.func @transform_4(%arg0: i32) -> (i32, i32) {
    %c0_i32 = arith.constant 0 : i32
    %c0_i32_0 = arith.constant 0 : i32
    %c0_i32_1 = arith.constant 0 : i32
    return %c0_i32, %c0_i32_0 : i32, i32
  }
  func.func @transform_5(%arg0: i32) -> (i32, i32) {
    %c0_i32 = arith.constant 0 : i32
    %c0_i32_0 = arith.constant 0 : i32
    %c0_i32_1 = arith.constant 0 : i32
    return %c0_i32, %c0_i32_0 : i32, i32
  }
  func.func @transform_6(%arg0: i32) -> (i32, i32) {
    %c0_i32 = arith.constant 0 : i32
    %c0_i32_0 = arith.constant 0 : i32
    %c0_i32_1 = arith.constant 0 : i32
    return %c0_i32, %c0_i32_0 : i32, i32
  }
  func.func @transform_7(%arg0: i32) -> (i32, i32) {
    %c0_i32 = arith.constant 0 : i32
    %c0_i32_0 = arith.constant 0 : i32
    return %arg0, %c0_i32 : i32, i32
  }
}

</mosaic_0001>

<bundles_post_ra>
// kernel: tpu_custom_call.1
= control target key start
LH: loop header
LB: loop body
LE: loop exit
PB: predicated region body
PF: predicated region fallthrough
CT: control target
= control target key end

     0   :  { %12 = vsyncpa [#allocation3], 0  ;;  %s751_s0 = inlined_call_operand.vmem [shape: f32[8,8], index: 0, kind: input, shape index: {}]   ;;  %s752_s1 = inlined_call_operand.hbm [shape: f32[8,128], index: 1, kind: input, shape index: {}]   ;;  %s753_s2 = inlined_call_operand.vmem [shape: f32[1,128], index: 2, kind: input, shape index: {}]   ;;  %s754_s3 = inlined_call_operand.vmem [shape: f32[128,128], index: 3, kind: input, shape index: {}]   ;;  %s755_s4 = inlined_call_operand.vmem [shape: f32[1,128], index: 4, kind: input, shape index: {}]   ;;  %s756_s5 = inlined_call_operand.vmem [shape: f32[128,8], index: 5, kind: input, shape index: {}]   ;;  %s757_s6 = inlined_call_operand.vmem [shape: f32[1,8], index: 6, kind: input, shape index: {}]   ;;  %s758_s7 = inlined_call_operand.hbm [shape: f32[8,8], index: 7, kind: output, shape index: {}]  }
   0x1   :  { %13 = vsyncpa [#allocation4], 0  ;;  %s553_s24 = smov [#allocation2]   ;;  %s505_s28 = scalar_lea.hbm %s752_s1, 128 }
   0x2   :  { %s22_s25 = sshll.u32 %s553_s24, 4  ;;  %p506_p0 = scmp.ne.s32.totalorder %s752_s1, %s505_s28  ;;  %s23_s25 = int_to_ptr.vmem [resolvable:$true] %s22_s25 }
   0x3   :  { %p509_p1 = scmp.lt.u32.totalorder %s505_s28, %s752_s1 }
   0x5   :  { %p511_p2 = pnand %p509_p1, %p506_p0 }
   0x7   :  { %514 = shalt.err (!%p511_p2)
}
   0x8   :  { %s515_s10 = scalar_lea.vmem %s23_s25, 128  ;;  %p520_p4 = scmp.lt.s32.totalorder %s23_s25, %s23_s25 }
   0x9   :  { %p516_p3 = scmp.ne.s32.totalorder %s23_s25, %s515_s10  ;;  %p521_p5 = scmp.lt.s32.totalorder %s515_s10, %s515_s10 }
   0xb   :  { %p522_p6 = por %p521_p5, %p520_p4 }
   0xd   :  { %p523_p7 = pnand %p522_p6, %p516_p3 }
   0xf   :  { %526 = shalt.err (!%p523_p7)
}
  0x10   :  { %25 = dma.hbm_to_vmem [thread:$0]  %s752_s1, 128, %s23_s25, [#allocation3]  }
  0x11   :  { %549 = dma.done.wait [#allocation3], 128  }
  0x12   :  { %550 = vsyncadd [#allocation3], 4294967168  ;;  %v554_v0 = vmov 0.0   ;;  %vm555_vm0 = vmmov 0   ;;  %v556_v1 = vmov 0.0|0.0   ;;  %vm48_vm1 = vcmask 64512  }
  0x13   :  { %375 = vmatprep.subr.mxu0 %v554_v0  ;;  %377 = vmatprep.mubr.msk.f32.mxu0 %vm555_vm0, %v554_v0  ;;  %v40_v2 = vld [vmem:[#allocation2] sm:$0xff]  ;;  %v124_v5 = vld [vmem:[%s754_s3 + $0x8] sm:$0xff]  ;;  %v125_v6 = vld [vmem:[%s754_s3 + $0x10] sm:$0xff] }
  0x14   :  { %450 = vmatprep.subr.bf16.mxu1 %v556_v1  ;;  %412 = vmatprep.mubr.msk.f32.mxu1 %vm555_vm0, %v554_v0  ;;  %v39_v3 = vld [vmem:[%s751_s0] sm:$0xff]  ;;  %v126_v7 = vld [vmem:[%s754_s3 + $0x18] sm:$0xff]  ;;  %v128_v11 = vld [vmem:[%s754_s3 + $0x28] sm:$0xff] }
  0x15   :  { %v123_v4 = vld [vmem:[%s754_s3] sm:$0xff]  ;;  %376 = vmatpush3.msra.mxu0 %v40_v2  ;;  %v454_v9 = vpack.c.bf16 %v126_v7, %v125_v6  ;;  %v129_v13 = vld [vmem:[%s754_s3 + $0x30] sm:$0xff]  ;;  %v130_v14 = vld [vmem:[%s754_s3 + $0x38] sm:$0xff]  ;;  %v313_v2 = vlaneseq }
  0x16   :  { %378 = vmatmul.mubr.msk.f32.vlgmr.msra.gmra.mrb[0].mxu0 %vm48_vm1, %v39_v3  ;;  %v451_v8 = vpack.c.bf16 %v124_v5, %v123_v4  ;;  %474 = vmatprep.subr.bf16.mxu0 %v556_v1  ;;  %v127_v10 = vld [vmem:[%s754_s3 + $0x20] sm:$0xff]  ;;  %v460_v15 = vpack.c.bf16 %v130_v14, %v129_v13  ;;  %v132_v17 = vld [vmem:[%s754_s3 + $0x48] sm:$0xff]  ;;  %v133_v19 = vld [vmem:[%s754_s3 + $0x50] sm:$0xff] }
  0x17   :  { %447 = vmatprep.mubr.msk.f32.mxu0 %vm555_vm0, %v554_v0  ;;  %v457_v12 = vpack.c.bf16 %v128_v11, %v127_v10  ;;  %v131_v16 = vld [vmem:[%s754_s3 + $0x40] sm:$0xff]  ;;  %v134_v20 = vld [vmem:[%s754_s3 + $0x58] sm:$0xff]  ;;  %v136_v23 = vld [vmem:[%s754_s3 + $0x68] sm:$0xff]  ;;  %v314_v3 = vand.u32 127, %v313_v2 }
  0x18   :  { %452 = vmatpush3.bf16.msra.mxu1 %v451_v8  ;;  %v463_v18 = vpack.c.bf16 %v132_v17, %v131_v16  ;;  %v466_v21 = vpack.c.bf16 %v134_v20, %v133_v19  ;;  %v135_v22 = vld [vmem:[%s754_s3 + $0x60] sm:$0xff]  ;;  %v137_v25 = vld [vmem:[%s754_s3 + $0x70] sm:$0xff]  ;;  %v138_v26 = vld [vmem:[%s754_s3 + $0x78] sm:$0xff] }
  0x19   :  { %453 = vmatprep.subr.bf16.mxu1 %v556_v1  ;;  %v469_v24 = vpack.c.bf16 %v136_v23, %v135_v22  ;;  %v472_v27 = vpack.c.bf16 %v138_v26, %v137_v25  ;;  %v217_v28 = vld [vmem:[%s756_s5] sm:$0xff]  ;;  %v218_v29 = vld [vmem:[%s756_s5 + $0x8] sm:$0xff]  ;;  %v219_v30 = vld [vmem:[%s756_s5 + $0x10] sm:$0xff]  ;;  %vm315_vm2 = vcmp.ge.s32.totalorder %v314_v3, 4 }
  0x1a   :  { %v475_v31 = vpack.c.bf16 %v218_v29, %v217_v28  ;;  %v220_v32 = vld [vmem:[%s756_s5 + $0x18] sm:$0xff]  ;;  %v221_v34 = vld [vmem:[%s756_s5 + $0x20] sm:$0xff]  ;;  %v222_v35 = vld [vmem:[%s756_s5 + $0x28] sm:$0xff] }
  0x1b   :  { %v478_v33 = vpack.c.bf16 %v220_v32, %v219_v30  ;;  %v481_v36 = vpack.c.bf16 %v222_v35, %v221_v34  ;;  %v223_v37 = vld [vmem:[%s756_s5 + $0x30] sm:$0xff]  ;;  %v224_v38 = vld [vmem:[%s756_s5 + $0x38] sm:$0xff]  ;;  %v225_v40 = vld [vmem:[%s756_s5 + $0x40] sm:$0xff] }
  0x1c   :  { %455 = vmatpush3.bf16.msra.mxu1 %v454_v9  ;;  %476 = vmatpush3.bf16.msra.mxu0 %v475_v31  ;;  %v484_v39 = vpack.c.bf16 %v224_v38, %v223_v37  ;;  %v226_v41 = vld [vmem:[%s756_s5 + $0x48] sm:$0xff]  ;;  %v227_v43 = vld [vmem:[%s756_s5 + $0x50] sm:$0xff]  ;;  %v228_v44 = vld [vmem:[%s756_s5 + $0x58] sm:$0xff] }
  0x1d   :  { %456 = vmatprep.subr.bf16.mxu1 %v556_v1  ;;  %477 = vmatprep.subr.bf16.mxu0 %v556_v1  ;;  %v487_v42 = vpack.c.bf16 %v226_v41, %v225_v40  ;;  %v490_v45 = vpack.c.bf16 %v228_v44, %v227_v43  ;;  %v229_v46 = vld [vmem:[%s756_s5 + $0x60] sm:$0xff]  ;;  %v230_v47 = vld [vmem:[%s756_s5 + $0x68] sm:$0xff]  ;;  %v231_v54 = vld [vmem:[%s756_s5 + $0x70] sm:$0xff] }
  0x1e   :  { %v493_v48 = vpack.c.bf16 %v230_v47, %v229_v46  ;;  %v335_v49 = vld [vmem:[%s753_s2] ss:$0 sm:$0xff]  ;;  %v232_v55 = vld [vmem:[%s756_s5 + $0x78] sm:$0xff]  ;;  %s557_s5 = smov [#allocation5]  }
  0x1f   :  { %v496_v56 = vpack.c.bf16 %v232_v55, %v231_v54  ;;  %v337_v57 = vld [vmem:[%s755_s4] ss:$0 sm:$0xff]  ;;  %s326_s30 = sshll.u32 %s557_s5, 4  ;;  %s327_s30 = int_to_ptr.vmem [resolvable:$true] %s326_s30 }
  0x20   :  { %458 = vmatpush3.bf16.msra.mxu1 %v457_v12  ;;  %479 = vmatpush3.bf16.msra.mxu0 %v478_v33  ;;  %v338_v62 = vld [vmem:[%s757_s6] ss:$0 sm:$0xff]  ;;  %s527_s4 = scalar_lea.vmem %s327_s30, 128  ;;  %p532_p9 = scmp.lt.s32.totalorder %s327_s30, %s327_s30 }
  0x21   :  { %459 = vmatprep.subr.bf16.mxu1 %v556_v1  ;;  %480 = vmatprep.subr.bf16.mxu0 %v556_v1  ;;  %p528_p8 = scmp.ne.s32.totalorder %s327_s30, %s527_s4  ;;  %p533_p10 = scmp.lt.s32.totalorder %s527_s4, %s527_s4 }
  0x23   :  { %p534_p11 = por %p533_p10, %p532_p9 }
  0x24   :  { %461 = vmatpush3.bf16.msra.mxu1 %v460_v15  ;;  %482 = vmatpush3.bf16.msra.mxu0 %v481_v36 }
  0x25   :  { %462 = vmatprep.subr.bf16.mxu1 %v556_v1  ;;  %483 = vmatprep.subr.bf16.mxu0 %v556_v1  ;;  %p535_p12 = pnand %p534_p11, %p528_p8 }
  0x28   :  { %464 = vmatpush3.bf16.msra.mxu1 %v463_v18  ;;  %485 = vmatpush3.bf16.msra.mxu0 %v484_v39 }
  0x29   :  { %465 = vmatprep.subr.bf16.mxu1 %v556_v1  ;;  %486 = vmatprep.subr.bf16.mxu0 %v556_v1 }
  0x2c   :  { %467 = vmatpush3.bf16.msra.mxu1 %v466_v21  ;;  %488 = vmatpush3.bf16.msra.mxu0 %v487_v42 }
  0x2d   :  { %468 = vmatprep.subr.bf16.mxu1 %v556_v1  ;;  %489 = vmatprep.subr.bf16.mxu0 %v556_v1 }
  0x30   :  { %470 = vmatpush3.bf16.msra.mxu1 %v469_v24  ;;  %491 = vmatpush3.bf16.msra.mxu0 %v490_v45 }
  0x31   :  { %471 = vmatprep.subr.bf16.mxu1 %v556_v1  ;;  %492 = vmatprep.subr.bf16.mxu0 %v556_v1 }
  0x34   :  { %473 = vmatpush3.bf16.msra.mxu1 %v472_v27  ;;  %494 = vmatpush3.bf16.msra.mxu0 %v493_v48 }
  0x35   :  { %495 = vmatprep.subr.bf16.mxu0 %v556_v1 }
  0x38   :  { %497 = vmatpush3.bf16.msra.mxu0 %v496_v56 }
  0xe9   :  { %v118_v50 = vpop.f32.mrb[0].mxu0 }
  0xea   :  { %v119_v51 = vadd.f32 %v335_v49, %v118_v50  ;;  %v379_v52 = vpop.f32.mrb[1].mxu0 }
  0xec   :  { %v122_v53 = vmax.f32 %v119_v51, 0.0 }
  0xee   :  { %413 = vmatmul.mubr.f32.vlgmr.msra.gmra.mrb[0].mxu1 %v122_v53 }
 0x1c1   :  { %v212_v58 = vpop.f32.mrb[0].mxu1 }
 0x1c2   :  { %v213_v59 = vadd.f32 %v337_v57, %v212_v58  ;;  %v414_v60 = vpop.f32.mrb[1].mxu1 }
 0x1c4   :  { %v216_v61 = vmax.f32 %v213_v59, 0.0 }
 0x1c6   :  { %448 = vmatmul.mubr.f32.vlgmr.msra.gmra.mrb[2].mxu0 %v216_v61 }
 0x299   :  { %v306_v63 = vpop.f32.mrb[2].mxu0 }
 0x29a   :  { %v307_v0 = vadd.f32 %v338_v62, %v306_v63  ;;  %v449_v1 = vpop.f32.mrb[3].mxu0 }
 0x29c   :  { %503 = vtanh.f32 %v307_v0 }
 0x2a6   :  { %v504_v4 = vpop.eup %503 }
 0x2a7   :  { %v311_v5 = vmul.f32 3.5, %v504_v4 }
 0x2a9   :  { %v312_v6 = vadd.f32 -1.5, %v311_v5 }
 0x2ab   :  { %v318_v7 = vsel %vm315_vm2, %v312_v6, %v307_v0 }
 0x2ac   :  { %319 = vst.msk [vmem:[#allocation5] sm:$0xff] %vm48_vm1, %v318_v7 }
 0x2ad   :  { %538 = shalt.err (!%p535_p12)
}
 0x2ae   :  { %s539_s9 = scalar_lea.hbm %s758_s7, 128 }
 0x2af   :  { %p540_p13 = scmp.ne.s32.totalorder %s758_s7, %s539_s9  ;;  %p543_p0 = scmp.lt.u32.totalorder %s539_s9, %s758_s7 }
 0x2b1   :  { %p545_p1 = pnand %p543_p0, %p540_p13 }
 0x2b3   :  { %548 = shalt.err (!%p545_p1)
}
 0x2b4   :  { %329 = dma.vmem_to_hbm [thread:$0]  %s327_s30, 128, %s758_s7, [#allocation4]  }
 0x2b5   :  { %551 = dma.done.wait [#allocation4], 128  }
 0x2b6   :  { %552 = vsyncadd [#allocation4], 4294967168 }
 0x2b7   :  { %333 = vsyncpa [#allocation3], 1 }
 0x2b8   :  { %334 = vsyncpa [#allocation4], 1 }

</bundles_post_ra>
